<compile_context>
chip_gen: v5e
topology: v5e:2x2
jax: 0.10.0
libtpu: 0.0.40
codegen_flags: <defaults>
</compile_context>

<pallas_src>
import jax
import jax.numpy as jnp
from jax.experimental import pallas as pl
from jax.experimental.pallas import tpu as pltpu


def set_criterion_kernel(logits_ref, sample_ref, target_ref, out_ref):
    # logits_ref: (K, B) f32  — class dim on sublanes, batch on lanes
    # sample_ref: (K, B) i32  — candidate labels per sample (transposed)
    # target_ref: (1, B) i32  — ground-truth label per sample
    # out_ref:    (2, 1) f32  — [[loss_ce (mean CE)], [success rate %]]
    K, B = logits_ref.shape
    logits = logits_ref[...].astype(jnp.float32)               # (K, B)
    sample = sample_ref[...]                                   # (K, B)
    tgt = target_ref[...]                                      # (1, B)

    # One-hot mask of the "true" class row per sample.
    # Precondition (same as the PyTorch .nonzero() path): exactly one match per sample;
    # if a sample had zero matches the PyTorch code would error, here z_true would be 0.
    eq = sample == tgt                                         # (K, B)

    # Row max reused for both the softmax shift and the argmax tie-mask.
    m = jnp.max(logits, axis=0, keepdims=True)                 # (1, B)
    z = logits - m                                             # (K, B)
    lse = jnp.log(jnp.sum(jnp.exp(z), axis=0, keepdims=True))  # (1, B)
    z_true = jnp.sum(jnp.where(eq, z, 0.0), axis=0, keepdims=True)   # (1, B)
    per_sample_loss = lse - z_true                             # (1, B)

    # argmax over the class dim (first maximal index).  It is compared against the raw
    # label value, faithfully mirroring the PyTorch code (only meaningful when label
    # values coincide with column indices) — do not "fix" either way.
    row = jax.lax.broadcasted_iota(jnp.int32, (K, B), 0)       # (K, B)
    pred = jnp.min(jnp.where(logits == m, row, K), axis=0, keepdims=True)   # (1, B)
    correct = (pred == tgt).astype(jnp.float32)                # (1, B)

    # Single fused lane reduction for both scalars.
    stacked = jnp.concatenate([per_sample_loss, correct], axis=0)   # (2, B)
    sums = jnp.sum(stacked, axis=1, keepdims=True)                  # (2, 1)

    idx = jax.lax.broadcasted_iota(jnp.int32, (2, 1), 0)
    scale = jnp.where(idx == 0, 1.0 / B, 100.0 / B)                 # mean CE / success %
    out_ref[...] = sums * scale


def _set_criterion_call(pred_logits, sample_lb, target_lb):
    """pred_logits: (B, 1, K); sample_lb: (B, K); target_lb: (B,).  Returns (2, 1) device array."""
    B, N, K = pred_logits.shape
    assert N == 1, "TransT SetCriterion uses a single query slot"
    # Layout plumbing in the wrapper: batch -> lanes, class dim -> sublanes.
    logits_t = jnp.transpose(pred_logits.reshape(B, K)).astype(jnp.float32)   # (K, B)
    sample_t = jnp.transpose(sample_lb.astype(jnp.int32))                      # (K, B)
    tgt = target_lb.astype(jnp.int32).reshape(1, B)                            # (1, B)

    out = pl.pallas_call(
        set_criterion_kernel,
        out_shape=jax.ShapeDtypeStruct((2, 1), jnp.float32),
        in_specs=[
            pl.BlockSpec(memory_space=pltpu.MemorySpace.VMEM),
            pl.BlockSpec(memory_space=pltpu.MemorySpace.VMEM),
            pl.BlockSpec(memory_space=pltpu.MemorySpace.VMEM),
        ],
        out_specs=pl.BlockSpec(memory_space=pltpu.MemorySpace.VMEM),
    )(logits_t, sample_t, tgt)
    return out


def set_criterion_forward(pred_logits, sample_lb, target_lb, name="train_source", i=0):
    out = _set_criterion_call(pred_logits, sample_lb, target_lb)
    loss_ce = out[0, 0]
    success_rate = out[1, 0]   # stays on device; no forced host sync on the hot path

    if i == 1:
        # Only pull the success rate to host when we actually need to print it.
        current_success_rate = float(jax.device_get(success_rate))
        if name == "train_source":
            print(f"Source success rate: {current_success_rate}%")
        else:
            print(f"Target success rate: {current_success_rate}%")
    return {"loss_ce": loss_ce}


if __name__ == "__main__":
    key = jax.random.PRNGKey(0)
    B = 8                 # batch (targets[0].shape[0])
    num_classes = 7
    K = num_classes + 1   # candidate / class slots

    # __init__-style buffer (unused in forward — cross_entropy is called without weight).
    eos_coef = 0.1
    empty_weight = jnp.ones((K,), jnp.float32).at[-1].set(eos_coef)  # noqa: F841
    # TODO(synk): matcher / weight_dict are unused in this forward path; not implemented.

    k1, k2, k3 = jax.random.split(key, 3)
    # each row of sample_lb is a permutation of the K class labels
    sample_lb = jnp.stack(
        [jax.random.permutation(jax.random.fold_in(k1, b), K) for b in range(B)]
    ).astype(jnp.int32)                                              # (B, K)
    tidx = jax.random.randint(k2, (B,), 0, K)                        # ground-truth column
    target_lb = sample_lb[jnp.arange(B), tidx].astype(jnp.int32)     # (B,)
    pred_logits = jax.random.normal(k3, (B, 1, K), jnp.float32)      # (B, 1, K)

    losses = set_criterion_forward(pred_logits, sample_lb, target_lb,
                                   name="train_source", i=0)
    loss_ce = jax.block_until_ready(losses["loss_ce"])

    # silent correctness checks against a pure-JAX reference of the PyTorch math
    target_kind = jnp.argmax(sample_lb == target_lb[:, None], axis=1)
    logp = jax.nn.log_softmax(pred_logits[:, 0, :], axis=-1)
    ref_loss = -jnp.mean(logp[jnp.arange(B), target_kind])
    assert jnp.allclose(loss_ce, ref_loss, atol=1e-5, rtol=1e-5)

    out = jax.block_until_ready(_set_criterion_call(pred_logits, sample_lb, target_lb))
    pred_ref = jnp.argmax(pred_logits[:, 0, :], axis=-1)
    ref_rate = 100.0 * jnp.sum((pred_ref == target_lb).astype(jnp.float32)) / B
    assert jnp.allclose(out[1, 0], ref_rate, atol=1e-5, rtol=1e-5)

    print("KERNEL_OK")
</pallas_src>

<mosaic_0001>
module attributes {stable_mosaic.version = 11 : i64} {
  func.func @set_criterion_kernel(%arg0: memref<8x8xf32, #tpu.memory_space<vmem>>, %arg1: memref<8x8xi32, #tpu.memory_space<vmem>>, %arg2: memref<1x8xi32, #tpu.memory_space<vmem>>, %arg3: memref<2x1xf32, #tpu.memory_space<vmem>>) attributes {dimension_semantics = [], scalar_prefetch = 0 : i64, scratch_operands = 0 : i64, tpu.core_type = #tpu.core_type<tc>} {
    %c0 = arith.constant 0 : index
    %c0_0 = arith.constant 0 : index
    %0 = vector.load %arg0[%c0, %c0_0] : memref<8x8xf32, #tpu.memory_space<vmem>>, vector<8x8xf32>
    %c0_1 = arith.constant 0 : index
    %c0_2 = arith.constant 0 : index
    %1 = vector.load %arg1[%c0_1, %c0_2] : memref<8x8xi32, #tpu.memory_space<vmem>>, vector<8x8xi32>
    %c0_3 = arith.constant 0 : index
    %c0_4 = arith.constant 0 : index
    %2 = vector.load %arg2[%c0_3, %c0_4] : memref<1x8xi32, #tpu.memory_space<vmem>>, vector<1x8xi32>
    %3 = vector.broadcast %2 : vector<1x8xi32> to vector<8x8xi32>
    %4 = arith.cmpi eq, %1, %3 : vector<8x8xi32>
    %cst = arith.constant dense<0xFF800000> : vector<8xf32>
    %5 = vector.multi_reduction <maximumf>, %0, %cst [0] : vector<8x8xf32> to vector<8xf32>
    %6 = vector.shape_cast %5 : vector<8xf32> to vector<1x8xf32>
    %7 = vector.broadcast %6 : vector<1x8xf32> to vector<8x8xf32>
    %8 = arith.subf %0, %7 : vector<8x8xf32>
    %9 = math.exp %8 : vector<8x8xf32>
    %cst_5 = arith.constant dense<0.000000e+00> : vector<8xf32>
    %10 = vector.multi_reduction <add>, %9, %cst_5 [0] : vector<8x8xf32> to vector<8xf32>
    %11 = vector.shape_cast %10 : vector<8xf32> to vector<1x8xf32>
    %12 = math.log %11 : vector<1x8xf32>
    %cst_6 = arith.constant 0.000000e+00 : f32
    %13 = vector.broadcast %cst_6 : f32 to vector<8x8xf32>
    %14 = arith.select %4, %8, %13 : vector<8x8xi1>, vector<8x8xf32>
    %cst_7 = arith.constant dense<0.000000e+00> : vector<8xf32>
    %15 = vector.multi_reduction <add>, %14, %cst_7 [0] : vector<8x8xf32> to vector<8xf32>
    %16 = vector.shape_cast %15 : vector<8xf32> to vector<1x8xf32>
    %17 = arith.subf %12, %16 : vector<1x8xf32>
    %18 = tpu.iota {dimensions = array<i32: 0>} : vector<8x8xi32>
    %19 = vector.broadcast %6 : vector<1x8xf32> to vector<8x8xf32>
    %20 = arith.cmpf oeq, %0, %19 : vector<8x8xf32>
    %c8_i32 = arith.constant 8 : i32
    %21 = vector.broadcast %c8_i32 : i32 to vector<8x8xi32>
    %22 = arith.select %20, %18, %21 : vector<8x8xi1>, vector<8x8xi32>
    %cst_8 = arith.constant dense<2147483647> : vector<8xi32>
    %23 = vector.multi_reduction <minsi>, %22, %cst_8 [0] : vector<8x8xi32> to vector<8xi32>
    %24 = vector.shape_cast %23 : vector<8xi32> to vector<1x8xi32>
    %25 = arith.cmpi eq, %24, %2 : vector<1x8xi32>
    %26 = arith.extui %25 : vector<1x8xi1> to vector<1x8xi32>
    %27 = arith.sitofp %26 : vector<1x8xi32> to vector<1x8xf32>
    %28 = tpu.concatenate %17, %27 in 0 : vector<1x8xf32>, vector<1x8xf32> -> vector<2x8xf32>
    %cst_9 = arith.constant dense<0.000000e+00> : vector<2xf32>
    %29 = vector.multi_reduction <add>, %28, %cst_9 [1] : vector<2x8xf32> to vector<2xf32>
    %30 = vector.shape_cast %29 : vector<2xf32> to vector<2x1xf32>
    %31 = tpu.iota {dimensions = array<i32: 0>} : vector<2x1xi32>
    %c0_i32 = arith.constant 0 : i32
    %32 = vector.broadcast %c0_i32 : i32 to vector<2x1xi32>
    %33 = arith.cmpi eq, %31, %32 : vector<2x1xi32>
    %cst_10 = arith.constant 1.250000e-01 : f32
    %cst_11 = arith.constant 1.250000e+01 : f32
    %34 = vector.broadcast %cst_10 : f32 to vector<2x1xf32>
    %35 = vector.broadcast %cst_11 : f32 to vector<2x1xf32>
    %36 = arith.select %33, %34, %35 : vector<2x1xi1>, vector<2x1xf32>
    %37 = arith.mulf %30, %36 : vector<2x1xf32>
    %c0_12 = arith.constant 0 : index
    %c0_13 = arith.constant 0 : index
    %38 = vector.load %arg3[%c0_12, %c0_13] : memref<2x1xf32, #tpu.memory_space<vmem>>, vector<2x1xf32>
    tpu.vector_store %arg3[%c0_12, %c0_13], %37 {strides = array<i32>} : memref<2x1xf32, #tpu.memory_space<vmem>>, vector<2x1xf32>,
    return
  }
}

</mosaic_0001>

<bundles_post_ra>
// kernel: tpu_custom_call.1
= control target key start
LH: loop header
LB: loop body
LE: loop exit
PB: predicated region body
PF: predicated region fallthrough
CT: control target
= control target key end

     0   :  { %8 = vsyncpa [#allocation3], 0  ;;  %s218_s0 = inlined_call_operand.hbm [shape: f32[8,8], index: 0, kind: input, shape index: {}]   ;;  %s219_s1 = inlined_call_operand.hbm [shape: s32[8,8], index: 1, kind: input, shape index: {}]   ;;  %s220_s2 = inlined_call_operand.vmem [shape: s32[1,8], index: 2, kind: input, shape index: {}]   ;;  %s221_s3 = inlined_call_operand.vmem [shape: f32[2,1], index: 3, kind: output, shape index: {}]  }
   0x1   :  { %s15_s14 = sshll.u32 %s218_s0, 4  ;;  %s16_s14 = int_to_ptr.hbm [resolvable:$true] %s15_s14 }
   0x2   :  { %9 = vsyncpa [#allocation5], 0  ;;  %s175_s15 = smov [#allocation2]   ;;  %s26_s19 = sshll.u32 %s219_s1, 4  ;;  %s27_s19 = int_to_ptr.hbm [resolvable:$true] %s26_s19 }
   0x3   :  { %s17_s16 = sshll.u32 %s175_s15, 4  ;;  %s176_s20 = smov [#allocation4]   ;;  %s18_s16 = int_to_ptr.vmem [resolvable:$true] %s17_s16 }
   0x4   :  { %20 = dma.hbm_to_vmem [thread:$0]  %s16_s14, 128, %s18_s16, [#allocation3]  }
   0x5   :  { %s28_s21 = sshll.u32 %s176_s20, 4  ;;  %s29_s21 = int_to_ptr.vmem [resolvable:$true] %s28_s21 }
   0x6   :  { %31 = dma.hbm_to_vmem [thread:$0]  %s27_s19, 128, %s29_s21, [#allocation5]  }
   0x7   :  { %171 = dma.done.wait [#allocation3], 128  }
   0x8   :  { %172 = vsyncadd [#allocation3], 4294967168 }
   0x9   :  { %173 = dma.done.wait [#allocation5], 128  }
   0xa   :  { %174 = vsyncadd [#allocation5], 4294967168  ;;  %vm47_vm0 = vcmask 64512   ;;  %v42_v0 = vld [vmem:[#allocation2] sm:$0xff]  ;;  %v76_v5 = vlaneseq  ;;  %v43_v9 = vld [vmem:[#allocation4] sm:$0xff]  ;;  %v177_v38 = vmov 0.0  }
   0xb   :  { %v48_v1 = vsel %vm47_vm0, %v42_v0, -inf  ;;  %v118_v7 = vld [vmem:[%s220_s2] ss:$0 sm:$0xff]  ;;  %vm96_vm7 = vcmask 1040384   ;;  %vm98_vm8 = vcmask 58368   ;;  %v178_v47 = vmov 12.5  }
   0xc   :  { %v49_v2 = vrot.slane %v48_v1, 4  ;;  %v77_v10 = vshrl.u32 %v76_v5, 7  ;;  %vm46_vm1 = vcmp.eq.s32.totalorder %v43_v9, %v118_v7  ;;  %v44_v34 = vld [vmem:[%s220_s2] sm:$0x1]  ;;  %vm105_vm10 = vcmask 1024  }
   0xe   :  { %v50_v3 = vmax.f32 %v48_v1, %v49_v2  ;;  %vm102_vm9 = vcmp.eq.s32.totalorder %v77_v10, 0 }
   0xf   :  { %v103_v48 = vsel %vm102_vm9, 0.125, %v178_v47 }
  0x10   :  { %v51_v4 = vrot.slane %v50_v3, 2 }
  0x12   :  { %v52_v6 = vmax.f32 %v50_v3, %v51_v4 }
  0x14   :  { %v53_v8 = vrot.slane %v52_v6, 1 }
  0x16   :  { %v54_v11 = vmax.f32 %v52_v6, %v53_v8 }
  0x18   :  { %v55_v12 = vsub.f32 %v42_v0, %v54_v11  ;;  %vm78_vm2 = vcmp.eq.f32.partialorder %v42_v0, %v54_v11 }
  0x19   :  { %v79_v13 = vsel %vm78_vm2, %v77_v10, 8 }
  0x1a   :  { %v56_v14 = vmul.f32 1.442695, %v55_v12  ;;  %v80_v15 = vsel %vm47_vm0, %v79_v13, 2147483647  ;;  %v67_v16 = vsel %vm46_vm1, %v55_v12, 0.0 }
  0x1b   :  { %v81_v17 = vrot.slane %v80_v15, 4  ;;  %v68_v18 = vsel %vm47_vm0, %v67_v16, 0.0 }
  0x1c   :  { %119 = vpow2.f32 %v56_v14  ;;  %v69_v21 = vrot.slane %v68_v18, 4 }
  0x1d   :  { %vm82_vm3 = vcmp.lt.s32.totalorder %v80_v15, %v81_v17 }
  0x1e   :  { %v83_v19 = vsel %vm82_vm3, %v80_v15, %v81_v17  ;;  %v70_v26 = vadd.f32 %v69_v21, %v68_v18 }
  0x1f   :  { %v84_v20 = vrot.slane %v83_v19, 2 }
  0x20   :  { %v71_v30 = vrot.slane %v70_v26, 2 }
  0x21   :  { %vm85_vm4 = vcmp.lt.s32.totalorder %v83_v19, %v84_v20 }
  0x22   :  { %v120_v22 = vpop.eup %119  ;;  %v86_v25 = vsel %vm85_vm4, %v83_v19, %v84_v20  ;;  %v72_v33 = vadd.f32 %v71_v30, %v70_v26 }
  0x23   :  { %v58_v23 = vsel %vm47_vm0, %v120_v22, 0.0  ;;  %v87_v28 = vrot.slane %v86_v25, 1 }
  0x24   :  { %v59_v24 = vrot.slane %v58_v23, 4  ;;  %v73_v37 = vrot.slane %v72_v33, 1 }
  0x25   :  { %vm88_vm5 = vcmp.lt.s32.totalorder %v86_v25, %v87_v28 }
  0x26   :  { %v60_v27 = vadd.f32 %v59_v24, %v58_v23  ;;  %v89_v36 = vsel %vm88_vm5, %v86_v25, %v87_v28  ;;  %v74_v40 = vadd.f32 %v73_v37, %v72_v33 }
  0x27   :  { %vm90_vm6 = vcmp.eq.s32.totalorder %v89_v36, %v44_v34 }
  0x28   :  { %v61_v29 = vrot.slane %v60_v27, 2  ;;  %v113_v39 = vsel %vm90_vm6, 1.0, %v177_v38 }
  0x29   :  { %v94_v43 = vrot.slane %v113_v39, 7 }
  0x2a   :  { %v62_v31 = vadd.f32 %v61_v29, %v60_v27 }
  0x2c   :  { %v63_v32 = vrot.slane %v62_v31, 1 }
  0x2e   :  { %v64_v35 = vadd.f32 %v63_v32, %v62_v31 }
  0x30   :  { %121 = vlog2.f32 %v64_v35 }
  0x36   :  { %v122_v41 = vpop.eup %121 }
  0x37   :  { %v66_v42 = vmul.f32 0.6931472, %v122_v41 }
  0x39   :  { %v75_v44 = vsub.f32 %v66_v42, %v74_v40 }
  0x3b   :  { %v97_v45 = vsel %vm96_vm7, %v75_v44, %v94_v43 }
  0x3c   :  { %v99_v46 = vsel %vm98_vm8, %v97_v45, 0.0 }
  0x3d   :  { %100 = vadd.xlane.f32.xlu0 %v99_v46 }
  0xb0   :  { %v101_v49 = vpop.xlane.xlu0 %100 }
  0xb1   :  { %v104_v50 = vmul.f32 %v103_v48, %v101_v49 }
  0xb3   :  { %106 = vst.msk [vmem:[%s221_s3] sm:$0x3] %vm105_vm10, %v104_v50 }
  0xb4   :  { %111 = vsyncpa [#allocation3], 1 }
  0xb5   :  { %112 = vsyncpa [#allocation5], 1 }

</bundles_post_ra>
